<compile_context>
chip_gen: v6e
topology: v6e:2x2x1
jax: 0.10.0
libtpu: 0.0.40
codegen_flags: <defaults>
</compile_context>

<pallas_src>
import functools

import jax
import jax.numpy as jnp
from jax.experimental import pallas as pl
from jax.experimental.pallas import tpu as pltpu


def _hardsigmoid(v):
    # PyTorch nn.Hardsigmoid: relu6(x + 3) / 6
    return jnp.clip(v + 3.0, 0.0, 6.0) * (1.0 / 6.0)


def _lse_kernel(w1_ref, b1_ref, w2_ref, b2_ref, x_ref, o_ref):
    """One grid step over a (C, tm) tile of pixels (lane dim = flattened H*W).

    w1_ref : VMEM (Cs, C)  -- fc1 1x1-conv weights
    b1_ref : VMEM (Cs, 1)  -- fc1 bias
    w2_ref : VMEM (C, Cs)  -- fc2 1x1-conv weights
    b2_ref : VMEM (C, 1)   -- fc2 bias
    x_ref  : VMEM (C, tm)  -- input tile (input dtype)
    o_ref  : VMEM (C, tm)  -- scale * x   (input dtype)
    """
    xf = x_ref[...].astype(jnp.float32)                                  # (C, tm)

    # fc1 (C -> Cs) + ReLU : channel contraction on the MXU (hidden under DMA).
    h = jnp.dot(w1_ref[...], xf, preferred_element_type=jnp.float32)     # (Cs, tm)
    h = jnp.maximum(h + b1_ref[...], 0.0)

    # fc2 (Cs -> C) + Hardsigmoid.
    s = jnp.dot(w2_ref[...], h, preferred_element_type=jnp.float32)      # (C, tm)
    s = _hardsigmoid(s + b2_ref[...])

    # Excitation: per-pixel, per-channel scaling of the input.
    o_ref[...] = (s * xf).astype(o_ref.dtype)


def _pick_tile(hw, c, dtype_bytes):
    """Lane tile: multiple of 128, as large as a modest VMEM budget allows."""
    c_pad = ((c + 7) // 8) * 8                 # channels pad to 8 sublanes
    # ~2 MiB for one (input + output) tile pair => ~4 MiB double-buffered,
    # comfortably under every generation's scoped-VMEM default (16 MiB on v5e).
    budget = 2 * 1024 * 1024
    cap = (budget // (2 * c_pad * max(dtype_bytes, 4))) // 128 * 128
    cap = max(128, min(cap, 32768))
    hw128 = pl.cdiv(hw, 128) * 128
    return min(cap, hw128)


@jax.jit
def local_squeeze_excitation(x, w1, b1, w2, b2):
    """x: (N, C, H, W).  Params use the nn.Module shapes:
    w1 (Cs, C, 1, 1), b1 (Cs,), w2 (C, Cs, 1, 1), b2 (C,).
    Returns (N, C, H, W) in x.dtype."""
    N, C, H, W = x.shape
    Cs = w1.shape[0]
    HW = H * W

    # ---- glue (free reshapes only, no transposes) ----
    x3 = x.reshape(N, C, HW)
    tm = _pick_tile(HW, C, x.dtype.itemsize)
    HW_pad = pl.cdiv(HW, tm) * tm
    if HW_pad != HW:
        x3 = jnp.pad(x3, ((0, 0), (0, 0), (0, HW_pad - HW)))

    w1_k = w1.reshape(Cs, C).astype(jnp.float32)
    b1_k = b1.reshape(Cs, 1).astype(jnp.float32)
    w2_k = w2.reshape(C, Cs).astype(jnp.float32)
    b2_k = b2.reshape(C, 1).astype(jnp.float32)

    grid = (N, HW_pad // tm)

    out = pl.pallas_call(
        _lse_kernel,
        out_shape=jax.ShapeDtypeStruct((N, C, HW_pad), x.dtype),
        grid=grid,
        in_specs=[
            pl.BlockSpec((Cs, C), lambda n, i: (0, 0)),          # w1 (resident)
            pl.BlockSpec((Cs, 1), lambda n, i: (0, 0)),          # b1
            pl.BlockSpec((C, Cs), lambda n, i: (0, 0)),          # w2
            pl.BlockSpec((C, 1), lambda n, i: (0, 0)),           # b2
            pl.BlockSpec((None, C, tm), lambda n, i: (n, 0, i)),  # x tile (kernel sees (C, tm))
        ],
        out_specs=pl.BlockSpec((None, C, tm), lambda n, i: (n, 0, i)),
        compiler_params=pltpu.CompilerParams(
            dimension_semantics=("parallel", "parallel"),
        ),
    )(w1_k, b1_k, w2_k, b2_k, x3)

    if HW_pad != HW:
        out = out[:, :, :HW]
    return out.reshape(N, C, H, W)


def _reference(x, w1, b1, w2, b2):
    """Pure-JAX reference matching the PyTorch forward (NCHW)."""
    N, C, H, W = x.shape
    Cs = w1.shape[0]
    xf = x.astype(jnp.float32)
    h = jnp.einsum("nchw,sc->nshw", xf, w1.reshape(Cs, C)) + b1[None, :, None, None]
    h = jnp.maximum(h, 0.0)
    s = jnp.einsum("nshw,cs->nchw", h, w2.reshape(C, Cs)) + b2[None, :, None, None]
    s = _hardsigmoid(s)
    return (s * xf).astype(x.dtype)


if __name__ == "__main__":
    N, C, Cs, H, W = 2, 4, 2, 16, 16   # input_channels=4, squeeze_channels=2

    key = jax.random.PRNGKey(0)
    k1, k2, k3, k4, kx = jax.random.split(key, 5)
    # deterministic synthetic params, shapes per nn.Conv2d(C, Cs, 1) / (Cs, C, 1)
    w1 = jax.random.normal(k1, (Cs, C, 1, 1), jnp.float32) * 0.5
    b1 = jax.random.normal(k2, (Cs,), jnp.float32) * 0.1
    w2 = jax.random.normal(k3, (C, Cs, 1, 1), jnp.float32) * 0.5
    b2 = jax.random.normal(k4, (C,), jnp.float32) * 0.1
    x = jax.random.normal(kx, (N, C, H, W), jnp.float32)

    out = local_squeeze_excitation(x, w1, b1, w2, b2)
    out = jax.block_until_ready(out)

    ref = _reference(x, w1, b1, w2, b2)
    assert out.shape == (N, C, H, W), out.shape
    assert jnp.allclose(out, ref, rtol=1e-4, atol=1e-4), float(jnp.max(jnp.abs(out - ref)))
    print("KERNEL_OK")
</pallas_src>

<mosaic_0001>
module attributes {stable_mosaic.version = 11 : i64} {
  func.func @_lse_kernel(%arg0: i32, %arg1: i32, %arg2: memref<2x4xf32, #tpu.memory_space<vmem>>, %arg3: memref<2x1xf32, #tpu.memory_space<vmem>>, %arg4: memref<4x2xf32, #tpu.memory_space<vmem>>, %arg5: memref<4x1xf32, #tpu.memory_space<vmem>>, %arg6: memref<1x4x256xf32, #tpu.memory_space<vmem>>, %arg7: memref<1x4x256xf32, #tpu.memory_space<vmem>>) attributes {dimension_semantics = [#tpu.dimension_semantics<parallel>, #tpu.dimension_semantics<parallel>], iteration_bounds = array<i64: 2, 1>, scalar_prefetch = 0 : i64, scratch_operands = 0 : i64, tpu.core_type = #tpu.core_type<tc>, window_params = [{pipeline_mode = #tpu.pipeline_mode<synchronous>, transform_indices = @transform_0, window_bounds = array<i64: 2, 4>}, {pipeline_mode = #tpu.pipeline_mode<synchronous>, transform_indices = @transform_1, window_bounds = array<i64: 2, 1>}, {pipeline_mode = #tpu.pipeline_mode<synchronous>, transform_indices = @transform_2, window_bounds = array<i64: 4, 2>}, {pipeline_mode = #tpu.pipeline_mode<synchronous>, transform_indices = @transform_3, window_bounds = array<i64: 4, 1>}, {transform_indices = @transform_4, window_bounds = array<i64: 1, 4, 256>}, {transform_indices = @transform_5, window_bounds = array<i64: 1, 4, 256>}]} {
    %c0 = arith.constant 0 : index
    %c0_0 = arith.constant 0 : index
    %c0_1 = arith.constant 0 : index
    %0 = vector.load %arg6[%c0, %c0_0, %c0_1] : memref<1x4x256xf32, #tpu.memory_space<vmem>>, vector<1x4x256xf32>
    %1 = vector.shape_cast %0 : vector<1x4x256xf32> to vector<4x256xf32>
    %c0_2 = arith.constant 0 : index
    %c0_3 = arith.constant 0 : index
    %2 = vector.load %arg2[%c0_2, %c0_3] : memref<2x4xf32, #tpu.memory_space<vmem>>, vector<2x4xf32>
    %cst = arith.constant dense<0.000000e+00> : vector<2x256xf32>
    %3 = tpu.matmul %2, %1, %cst {dimension_numbers = #tpu.dot_dimension_numbers<[1], [0], [0], [1], [0, 0, 1, 1], [], []>} : vector<2x4xf32>, vector<4x256xf32>, vector<2x256xf32> -> vector<2x256xf32>
    %c0_4 = arith.constant 0 : index
    %c0_5 = arith.constant 0 : index
    %4 = vector.load %arg3[%c0_4, %c0_5] : memref<2x1xf32, #tpu.memory_space<vmem>>, vector<2x1xf32>
    %5 = vector.broadcast %4 : vector<2x1xf32> to vector<2x256xf32>
    %6 = arith.addf %3, %5 : vector<2x256xf32>
    %cst_6 = arith.constant 0.000000e+00 : f32
    %7 = vector.broadcast %cst_6 : f32 to vector<2x256xf32>
    %8 = arith.maximumf %6, %7 : vector<2x256xf32>
    %c0_7 = arith.constant 0 : index
    %c0_8 = arith.constant 0 : index
    %9 = vector.load %arg4[%c0_7, %c0_8] : memref<4x2xf32, #tpu.memory_space<vmem>>, vector<4x2xf32>
    %cst_9 = arith.constant dense<0.000000e+00> : vector<4x256xf32>
    %10 = tpu.matmul %9, %8, %cst_9 {dimension_numbers = #tpu.dot_dimension_numbers<[1], [0], [0], [1], [0, 0, 1, 1], [], []>} : vector<4x2xf32>, vector<2x256xf32>, vector<4x256xf32> -> vector<4x256xf32>
    %c0_10 = arith.constant 0 : index
    %c0_11 = arith.constant 0 : index
    %11 = vector.load %arg5[%c0_10, %c0_11] : memref<4x1xf32, #tpu.memory_space<vmem>>, vector<4x1xf32>
    %12 = vector.broadcast %11 : vector<4x1xf32> to vector<4x256xf32>
    %13 = arith.addf %10, %12 : vector<4x256xf32>
    %cst_12 = arith.constant 3.000000e+00 : f32
    %14 = vector.broadcast %cst_12 : f32 to vector<4x256xf32>
    %15 = arith.addf %13, %14 : vector<4x256xf32>
    %cst_13 = arith.constant 0.000000e+00 : f32
    %cst_14 = arith.constant 6.000000e+00 : f32
    %16 = vector.broadcast %cst_13 : f32 to vector<4x256xf32>
    %17 = arith.maximumf %16, %15 : vector<4x256xf32>
    %18 = vector.broadcast %cst_14 : f32 to vector<4x256xf32>
    %19 = arith.minimumf %18, %17 : vector<4x256xf32>
    %cst_15 = arith.constant 0.166666672 : f32
    %20 = vector.broadcast %cst_15 : f32 to vector<4x256xf32>
    %21 = arith.mulf %19, %20 : vector<4x256xf32>
    %22 = arith.mulf %21, %1 : vector<4x256xf32>
    %c0_16 = arith.constant 0 : index
    %c0_17 = arith.constant 0 : index
    %c0_18 = arith.constant 0 : index
    %23 = vector.load %arg7[%c0_16, %c0_17, %c0_18] : memref<1x4x256xf32, #tpu.memory_space<vmem>>, vector<1x4x256xf32>
    %24 = vector.shape_cast %23 : vector<1x4x256xf32> to vector<4x256xf32>
    %25 = vector.shape_cast %22 : vector<4x256xf32> to vector<1x4x256xf32>
    tpu.vector_store %arg7[%c0_16, %c0_17, %c0_18], %25 {strides = array<i32>} : memref<1x4x256xf32, #tpu.memory_space<vmem>>, vector<1x4x256xf32>,
    return
  }
  func.func @transform_0(%arg0: i32, %arg1: i32) -> (i32, i32) {
    %c0_i32 = arith.constant 0 : i32
    %c0_i32_0 = arith.constant 0 : i32
    %c0_i32_1 = arith.constant 0 : i32
    return %c0_i32, %c0_i32_0 : i32, i32
  }
  func.func @transform_1(%arg0: i32, %arg1: i32) -> (i32, i32) {
    %c0_i32 = arith.constant 0 : i32
    %c0_i32_0 = arith.constant 0 : i32
    %c0_i32_1 = arith.constant 0 : i32
    return %c0_i32, %c0_i32_0 : i32, i32
  }
  func.func @transform_2(%arg0: i32, %arg1: i32) -> (i32, i32) {
    %c0_i32 = arith.constant 0 : i32
    %c0_i32_0 = arith.constant 0 : i32
    %c0_i32_1 = arith.constant 0 : i32
    return %c0_i32, %c0_i32_0 : i32, i32
  }
  func.func @transform_3(%arg0: i32, %arg1: i32) -> (i32, i32) {
    %c0_i32 = arith.constant 0 : i32
    %c0_i32_0 = arith.constant 0 : i32
    %c0_i32_1 = arith.constant 0 : i32
    return %c0_i32, %c0_i32_0 : i32, i32
  }
  func.func @transform_4(%arg0: i32, %arg1: i32) -> (i32, i32, i32) {
    %c0_i32 = arith.constant 0 : i32
    %c0_i32_0 = arith.constant 0 : i32
    return %arg0, %c0_i32, %arg1 : i32, i32, i32
  }
  func.func @transform_5(%arg0: i32, %arg1: i32) -> (i32, i32, i32) {
    %c0_i32 = arith.constant 0 : i32
    %c0_i32_0 = arith.constant 0 : i32
    return %arg0, %c0_i32, %arg1 : i32, i32, i32
  }
}

</mosaic_0001>

<bundles_post_ra>
// kernel: local_squeeze_excitation.1
= control target key start
LH: loop header
LB: loop body
LE: loop exit
PB: predicated region body
PF: predicated region fallthrough
CT: control target
= control target key end

     0   :  { %s651_s18 = smov 0   ;;  %s653_s19 = smov 0   ;;  %s703_s0 = inlined_call_operand.vmem [shape: f32[2,4], index: 0, kind: input, shape index: {}]   ;;  %s704_s1 = inlined_call_operand.vmem [shape: f32[2,1], index: 1, kind: input, shape index: {}]   ;;  %s705_s2 = inlined_call_operand.vmem [shape: f32[4,2], index: 2, kind: input, shape index: {}]   ;;  %s706_s3 = inlined_call_operand.vmem [shape: f32[4,1], index: 3, kind: input, shape index: {}]   ;;  %s707_s4 = inlined_call_operand.vmem [shape: f32[2,4,256], index: 4, kind: input, shape index: {}]   ;;  %s708_s5 = inlined_call_operand.vmem [shape: f32[2,4,256], index: 5, kind: output, shape index: {}]  }
   0x1   :  { %s655_s20 = smov 0  }
   0x2 LB: > { %s27_s21 = sadd.s32 1, %s613_s19  ;;  %p552_p0 = scmp.ge.s32.totalorder %s617_s20, 1  ;;  %s617_s20 = sphi %s655_s20, %s15_s20   ;;  %s613_s19 = sphi %s653_s19, %s710_s19   ;;  %s609_s18 = sphi %s651_s18, %s709_s18  }
   0x3   : > { %p29_p1 = scmp.ge.s32.totalorder %s27_s21, 2  ;;  %p208_p2 = scmp.lt.s32.totalorder %s617_s20, 3 }
   0x5   : > { %s712_s21 = smov (%p29_p1, %s27_s21), 0  ;;  %p209_p3 = pnand %p552_p0, %p208_p2 }
   0x6   : > { %p245_p4 = scmp.lt.s32.totalorder (!%p209_p3), %s609_s18, 1 }
   0x7   : > { %212 = sbr.rel (%p209_p3) target bundleno = 431 (0x1af), region = 40 }
   0xc   : > { %v619_v0 = vmov 0.0   ;;  %v266_v1 = vld [vmem:[%s704_s1] sm:$0x3]  ;;  %s714_s18 = smov (!%p245_p4, %s609_s18), 1  ;;  %v620_v2 = vmov 0   ;;  %vm278_vm0 = vcmask 1043456  }
   0xd   : > { %347 = vmatprep.mubr.f32.mxu0 %v619_v0  ;;  %438 = vmatprep.mubr.f32.mxu1 %v619_v0  ;;  %s565_s24 = sshll.u32 %s714_s18, 3  ;;  %v357_v3 = vld [vmem:[%s706_s3] sm:$0xf]  ;;  %vm274_vm1 = vcmask 31744   ;;  %vm367_vm2 = vcmask 1041408   ;;  %vm363_vm3 = vcmask 15360  }
   0xe   : > { %593 = vset.pattern.permute.xlu0 %v620_v2  ;;  %s252_s29 = scalar_lea.vmem %s707_s4, %s565_s24  ;;  %v265_v6 = vld [vmem:[%s703_s0] sm:$0x3]  ;;  %s262_s11 = scalar_lea.vmem %s708_s5, %s565_s24 }
   0xf   : > { %269 = vperm.xlu0 %593, %v266_v1   ;;  %v264_v4 = vld [vmem:[%s252_s29] sm:$0xff] }
  0x10   : > { %v273_v5 = vcombine.high %v264_v4, %v264_v4  ;;  %v356_v14 = vld [vmem:[%s705_s2] sm:$0xf] }
  0x12   : > { %557 = vmatprep.subr.msk.mxu0 %vm278_vm0, %v273_v5 }
  0x13   : > { %360 = vperm.xlu0 %593, %v357_v3   ;;  %558 = vmatpush1.msk.msra.mxu0 %vm278_vm0, %v264_v4 }
  0x14   : > { %559 = vmatmul.mubr.msk.f32.vlgmr.msra.gmra.mxu0 %vm274_vm1, %v265_v6 }
  0x8a   : > { %v270_v8 = vpop.permute.xlu0 %269 }
  0x8e   : > { %v361_v15 = vpop.permute.xlu0 %360 }
  0xd4   : > { %v349_v7 = vpop.f32.mrf.mxu0 }
  0xd5   : > { %v350_v9 = vadd.f32 %v349_v7, %v270_v8 }
  0xd6   : > { %v351_v10 = vpop.f32.mrf.mxu0 }
  0xd7   : > { %v352_v11 = vadd.f32 %v351_v10, %v270_v8  ;;  %v354_v13 = vmax.f32 %v350_v9, 0.0 }
  0xd9   : > { %v355_v12 = vmax.f32 %v352_v11, 0.0 }
  0xdb   : > { %560 = vmatprep.subr.msk.mxu1 %vm367_vm2, %v355_v12 }
  0xdc   : > { %561 = vmatpush1.msk.msra.mxu1 %vm367_vm2, %v354_v13 }
  0xdd   : > { %562 = vmatmul.mubr.msk.f32.vlgmr.msra.gmra.mxu1 %vm363_vm3, %v356_v14 }
 0x19d   : > { %v440_v16 = vpop.f32.mrf.mxu1 }
 0x19e   : > { %v441_v17 = vadd.f32 %v440_v16, %v361_v15 }
 0x19f   : > { %v442_v18 = vpop.f32.mrf.mxu1 }
 0x1a0   : > { %v445_v19 = vadd.f32 3.0, %v441_v17  ;;  %v443_v20 = vadd.f32 %v442_v18, %v361_v15 }
 0x1a2   : > { %v447_v21 = vmax.f32 %v445_v19, 0.0  ;;  %v446_v22 = vadd.f32 3.0, %v443_v20 }
 0x1a4   : > { %v449_v23 = vmin.f32 %v447_v21, 6.0  ;;  %v448_v24 = vmax.f32 %v446_v22, 0.0 }
 0x1a6   : > { %v451_v25 = vmul.f32 0.16666667, %v449_v23  ;;  %v450_v26 = vmin.f32 %v448_v24, 6.0 }
 0x1a8   : > { %v452_v27 = vmul.f32 0.16666667, %v450_v26  ;;  %v454_v28 = vmul.f32 %v451_v25, %v264_v4 }
 0x1aa   : > { %v455_v29 = vmul.f32 %v452_v27, %v273_v5 }
 0x1ac   : > { %v458_v30 = vcombine.low %v454_v28, %v455_v29 }
 0x1ae   : > { %460 = vst [vmem:[%s262_s11] sm:$0xff] %v458_v30 }
 0x1af PF: > { %s15_s20 = sadd.s32 1, %s617_s20   ;;  %s709_s18 = smov %s613_s19 }
 0x1b0   : > { %p12_p5 = scmp.ge.s32.totalorder %s15_s20, 4   ;;  %s710_s19 = smov %s712_s21 }
 0x1b2   :  { %14 = sbr.rel (!%p12_p5) target bundleno = 2 (0x2), region = 70 }

</bundles_post_ra>
